<compile_context>
chip_gen: v7x
topology: tpu7x:2x2x1
jax: 0.10.0
libtpu: 0.0.40
codegen_flags: <defaults>
</compile_context>

<pallas_src>
import jax
import jax.numpy as jnp
from jax.experimental import pallas as pl
from jax.experimental.pallas import tpu as pltpu

# ~2 MiB per-array tile -> 2 arrays x 2 buffers = 8 MiB in flight, safe on
# every generation's default scoped VMEM.
_TARGET_TILE_BYTES = 2 * 1024 * 1024
# Threshold for the single whole-array block fallback (non-128-divisible sizes).
_SMALL_WHOLE_ARRAY_BYTES = 2 * 1024 * 1024


def _identity_copy_kernel(x_ref, o_ref):
    # The module's entire forward: y = x (whole-tile VMEM copy).
    o_ref[...] = x_ref[...]


def _sublane_multiple(dtype) -> int:
    # Sub-32-bit dtypes pack along sublanes: f32 -> 8, bf16/f16 -> 16, int8/fp8 -> 32.
    itemsize = jnp.dtype(dtype).itemsize
    return max(8, 32 // max(1, itemsize))


def _pallas_identity_copy(x: jax.Array) -> jax.Array:
    """Identity implemented as an HBM-roofline Pallas streaming copy.

    No padding and no trailing slice: exactly one HBM read and one HBM write
    of the tensor.
    """
    total = int(x.size)
    if total == 0:
        return x

    itemsize = jnp.dtype(x.dtype).itemsize
    sublanes = _sublane_multiple(x.dtype)

    # Largest lane-dense last dim that divides the element count exactly.
    lanes = next((c for c in (1024, 512, 256, 128) if total % c == 0), 0)

    if lanes == 0:
        # Element count not a multiple of 128.  Small tensors: single
        # whole-array block copy (full-extent blocks bypass the (8,128)
        # divisibility rule).  Large tensors: return x directly -- padding or
        # slicing around the kernel would cost two extra whole-tensor HBM
        # round trips for a parameterless identity.
        if total * itemsize <= _SMALL_WHOLE_ARRAY_BYTES:
            out = pl.pallas_call(
                _identity_copy_kernel,
                out_shape=jax.ShapeDtypeStruct((1, total), x.dtype),
            )(x.reshape(1, total))
            return out.reshape(x.shape)
        return x

    rows = total // lanes
    slab = x.reshape(rows, lanes)

    # Largest block (multiple of the dtype's sublane packing) whose per-array
    # tile stays at ~2 MiB.
    max_block_rows = max(
        sublanes,
        (_TARGET_TILE_BYTES // (lanes * itemsize)) // sublanes * sublanes,
    )

    if rows <= sublanes:
        # Tiny slab: one full-extent block (no divisibility requirement).
        block_rows = rows
    else:
        # Aim for >= 2 blocks so the "parallel" grid axis can be sharded
        # across v7x's two TensorCores even for mid-size tensors.
        two_block_rows = (((rows + 1) // 2 + sublanes - 1) // sublanes) * sublanes
        block_rows = max(sublanes, min(max_block_rows, two_block_rows))

    num_blocks = pl.cdiv(rows, block_rows)

    out = pl.pallas_call(
        _identity_copy_kernel,
        out_shape=jax.ShapeDtypeStruct((rows, lanes), x.dtype),
        grid=(num_blocks,),
        in_specs=[pl.BlockSpec((block_rows, lanes), lambda i: (i, 0))],
        out_specs=pl.BlockSpec((block_rows, lanes), lambda i: (i, 0)),
        compiler_params=pltpu.CompilerParams(
            # Shards the streaming copy across v7x's two TensorCores; harmless
            # no-op on single-TC v5e / v6e.
            dimension_semantics=("parallel",),
        ),
    )(slab)

    return out.reshape(x.shape)


def discriminator_forward(x: jax.Array, *, run_pallas_copy: bool = False) -> jax.Array:
    """Discriminator.forward — a pure identity (the module has no parameters).

    Production path: `return x` (optimal: zero HBM traffic).
    `run_pallas_copy=True`: route through the Pallas streaming-copy kernel so
    the TPU memory path is exercised and verified.
    """
    if run_pallas_copy:
        return _pallas_identity_copy(x)
    return x


if __name__ == "__main__":
    key = jax.random.PRNGKey(0)
    k1, k2 = jax.random.split(key)

    # NCHW input consistent with the module's default input_channels=3.
    x = jax.random.normal(k1, (2, 3, 16, 16), dtype=jnp.float32)

    # Production path: literal identity, no kernel launch.
    y_prod = discriminator_forward(x)
    assert y_prod is x

    # Verification path 1: Pallas copy, single full-extent block (1536 elems
    # -> (3, 512) lane-dense slab).
    y = jax.jit(lambda a: discriminator_forward(a, run_pallas_copy=True))(x)
    jax.block_until_ready(y)
    assert y.shape == x.shape
    assert y.dtype == x.dtype
    assert bool(jnp.array_equal(y, x))

    # Verification path 2: multi-block grid with a ragged (masked) final block
    # and a 2-block "parallel" axis (24576 elems -> (24, 1024) slab, block 16).
    x2 = jax.random.normal(k2, (2, 3, 64, 64), dtype=jnp.float32)
    y2 = jax.jit(lambda a: discriminator_forward(a, run_pallas_copy=True))(x2)
    jax.block_until_ready(y2)
    assert bool(jnp.array_equal(y2, x2))

    print("KERNEL_OK")
</pallas_src>

<mosaic_0001>
module attributes {stable_mosaic.version = 11 : i64} {
  func.func @_identity_copy_kernel(%arg0: i32, %arg1: memref<3x512xf32, #tpu.memory_space<vmem>>, %arg2: memref<3x512xf32, #tpu.memory_space<vmem>>) attributes {dimension_semantics = [#tpu.dimension_semantics<parallel>], iteration_bounds = array<i64: 1>, scalar_prefetch = 0 : i64, scratch_operands = 0 : i64, tpu.core_type = #tpu.core_type<tc>, window_params = [{transform_indices = @transform_0, window_bounds = array<i64: 3, 512>}, {transform_indices = @transform_1, window_bounds = array<i64: 3, 512>}]} {
    %c0 = arith.constant 0 : index
    %c0_0 = arith.constant 0 : index
    %0 = vector.load %arg1[%c0, %c0_0] : memref<3x512xf32, #tpu.memory_space<vmem>>, vector<3x512xf32>
    %c0_1 = arith.constant 0 : index
    %c0_2 = arith.constant 0 : index
    %1 = vector.load %arg2[%c0_1, %c0_2] : memref<3x512xf32, #tpu.memory_space<vmem>>, vector<3x512xf32>
    tpu.vector_store %arg2[%c0_1, %c0_2], %0 {strides = array<i32>} : memref<3x512xf32, #tpu.memory_space<vmem>>, vector<3x512xf32>,
    return
  }
  func.func @transform_0(%arg0: i32) -> (i32, i32) {
    %c0_i32 = arith.constant 0 : i32
    %c0_i32_0 = arith.constant 0 : i32
    return %arg0, %c0_i32 : i32, i32
  }
  func.func @transform_1(%arg0: i32) -> (i32, i32) {
    %c0_i32 = arith.constant 0 : i32
    %c0_i32_0 = arith.constant 0 : i32
    return %arg0, %c0_i32 : i32, i32
  }
}

</mosaic_0001>

<bundles_post_ra>
// kernel: _lambda_.1
= control target key start
LH: loop header
LB: loop body
LE: loop exit
PB: predicated region body
PF: predicated region fallthrough
CT: control target
= control target key end

     0   :  { %s38_s0 = inlined_call_operand.vmem [shape: f32[3,512], index: 0, kind: input, shape index: {}]   ;;  %s39_s1 = inlined_call_operand.vmem [shape: f32[3,512], index: 1, kind: output, shape index: {}]  }
   0x1   :  { %v8_v0 = vld [vmem:[%s38_s0] sm:$0x77]  ;;  %v9_v1 = vld [vmem:[%s38_s0 + $0x8] sm:$0x77] }
   0x2   :  { %10 = vst [vmem:[%s39_s1] sm:$0x77] %v8_v0  ;;  %11 = vst [vmem:[%s39_s1 + $0x8] sm:$0x77] %v9_v1 }

</bundles_post_ra>
